<compile_context>
chip_gen: v7x
topology: tpu7x:2x2x1
jax: 0.10.0
libtpu: 0.0.40
codegen_flags: <defaults>
</compile_context>

<pallas_src>
import jax
import jax.numpy as jnp
from jax.experimental import pallas as pl
from jax.experimental.pallas import tpu as pltpu

_LANE = 128
_SUBLANE = 8
_MAX_TILE_ROWS = 2048                 # (2048, 128) f32 block = 1 MiB per input
_TINY_THRESHOLD = _SUBLANE * _LANE    # below this, kernel launch isn't worth it


def _round_up(n, m):
    return ((n + m - 1) // m) * m


def _mse_partial_sums(x2d, y2d, *, rows, tile_rows, tiles, tiles_per_core,
                      n_cores, needs_mask, bytes_accessed):
    """Per-core partial sums of (x - y)**2 over a (rows, 128) lane-dense slab."""

    def kernel(x_ref, y_ref, out_ref, acc_ref):
        c = pl.program_id(0)
        i = pl.program_id(1)

        @pl.when(i == 0)
        def _init():
            acc_ref[...] = jnp.zeros_like(acc_ref)

        d = x_ref[...].astype(jnp.float32) - y_ref[...].astype(jnp.float32)
        sq = d * d
        if needs_mask:
            # Rows past `rows` are Pallas block padding (or a phantom block of
            # a core with fewer tiles): force their contribution to zero.
            row_base = (c * tiles_per_core + i) * tile_rows
            row_idx = jax.lax.broadcasted_iota(jnp.int32, (tile_rows, 1), 0) + row_base
            sq = jnp.where(row_idx < rows, sq, 0.0)
        acc_ref[...] += sq            # elementwise VPU add; no per-step reduce

        @pl.when(i == tiles_per_core - 1)
        def _finalize():
            # Single cross-lane/sublane reduce per core, done once at the end.
            out_ref[0] = jnp.sum(acc_ref[...], keepdims=True)

    def block_map(c, i):
        # Clamp so a phantom trailing block (odd tile count split over 2 cores)
        # stays in bounds; its contribution is masked to zero in the kernel.
        return (jnp.minimum(c * tiles_per_core + i, tiles - 1), 0)

    return pl.pallas_call(
        kernel,
        out_shape=jax.ShapeDtypeStruct((n_cores, 1, 1), jnp.float32),
        grid_spec=pltpu.PrefetchScalarGridSpec(
            num_scalar_prefetch=0,
            grid=(n_cores, tiles_per_core),
            in_specs=[
                pl.BlockSpec((tile_rows, _LANE), block_map),
                pl.BlockSpec((tile_rows, _LANE), block_map),
            ],
            out_specs=pl.BlockSpec((1, 1, 1), lambda c, i: (c, 0, 0)),
            scratch_shapes=[pltpu.VMEM((tile_rows, _LANE), jnp.float32)],
        ),
        compiler_params=pltpu.CompilerParams(
            dimension_semantics=("parallel", "arbitrary"),
        ),
        cost_estimate=pl.CostEstimate(
            flops=3 * rows * _LANE,
            transcendentals=0,
            bytes_accessed=bytes_accessed,
        ),
    )(x2d, y2d)


def mse_loss(x, y):
    """Pallas equivalent of torch.nn.functional.mse_loss(x, y) (mean reduction)."""
    assert x.shape == y.shape, "mse_loss expects matching shapes"
    n_elem = x.size
    out_dtype = jnp.result_type(x.dtype, y.dtype)

    # Tiny inputs: fixed launch/pipeline overhead exceeds the work.
    if n_elem < _TINY_THRESHOLD:
        d = x.astype(jnp.float32) - y.astype(jnp.float32)
        return (jnp.sum(d * d) / jnp.float32(n_elem)).astype(out_dtype)

    # Flatten to a lane-dense 2D slab in native dtype (cast happens in-kernel).
    # Only a <=127-element pad is ever materialized; row raggedness is masked
    # inside the kernel using static shape info.
    xf = x.reshape(-1)
    yf = y.reshape(-1)
    lane_pad = (-n_elem) % _LANE
    if lane_pad:
        xf = jnp.pad(xf, (0, lane_pad))
        yf = jnp.pad(yf, (0, lane_pad))
    rows = (n_elem + lane_pad) // _LANE
    x2d = xf.reshape(rows, _LANE)
    y2d = yf.reshape(rows, _LANE)

    # Tile sizing: biggest row tile that comfortably fits every generation's
    # scoped VMEM, rounded so sub-32-bit dtypes keep packed sublane tiling.
    itemsize_x = int(jnp.dtype(x.dtype).itemsize)
    itemsize_y = int(jnp.dtype(y.dtype).itemsize)
    pack = max(_SUBLANE, 32 // max(min(itemsize_x, itemsize_y), 1))
    tile_rows = min(_MAX_TILE_ROWS, _round_up(rows, pack))
    tiles = pl.cdiv(rows, tile_rows)
    n_cores = 2 if tiles >= 2 else 1          # two partials for v7x megacore
    tiles_per_core = pl.cdiv(tiles, n_cores)
    needs_mask = (n_cores * tiles_per_core * tile_rows) != rows

    bytes_accessed = n_elem * (itemsize_x + itemsize_y) + 4 * n_cores

    partials = _mse_partial_sums(
        x2d, y2d, rows=rows, tile_rows=tile_rows, tiles=tiles,
        tiles_per_core=tiles_per_core, n_cores=n_cores, needs_mask=needs_mask,
        bytes_accessed=bytes_accessed)

    total = jnp.sum(partials)
    return (total / jnp.float32(n_elem)).astype(out_dtype)


if __name__ == "__main__":
    key = jax.random.PRNGKey(0)

    def check(shape, k):
        kx, ky = jax.random.split(k)
        x = jax.random.normal(kx, shape, dtype=jnp.float32)
        y = jax.random.normal(ky, shape, dtype=jnp.float32)
        loss = mse_loss(x, y)
        jax.block_until_ready(loss)
        ref = jnp.mean((x - y) ** 2)
        assert jnp.allclose(loss, ref, rtol=1e-5, atol=1e-6), (shape, loss, ref)

    k1, k2, k3 = jax.random.split(key, 3)
    # Primary case: small NCHW tensors, consistent with an image training loss.
    check((2, 4, 16, 16), k1)
    # Ragged element count: exercises the in-kernel tail mask.
    check((2, 4, 33, 47), k2)
    # Multi-tile case: exercises the big-tile pipeline + 2-partial (megacore) path.
    check((8, 16, 64, 64), k3)

    print("KERNEL_OK")
</pallas_src>

<mosaic_0001>
module attributes {stable_mosaic.version = 11 : i64} {
  func.func @kernel(%arg0: i32, %arg1: i32, %arg2: memref<16x128xf32, #tpu.memory_space<vmem>>, %arg3: memref<16x128xf32, #tpu.memory_space<vmem>>, %arg4: memref<1x1x1xf32, #tpu.memory_space<vmem>>, %arg5: memref<16x128xf32, #tpu.memory_space<vmem>>) attributes {dimension_semantics = [#tpu.dimension_semantics<parallel>, #tpu.dimension_semantics<arbitrary>], iteration_bounds = array<i64: 1, 1>, scalar_prefetch = 0 : i64, scratch_operands = 1 : i64, tpu.core_type = #tpu.core_type<tc>, window_params = [{transform_indices = @transform_0, window_bounds = array<i64: 16, 128>}, {transform_indices = @transform_1, window_bounds = array<i64: 16, 128>}, {transform_indices = @transform_2, window_bounds = array<i64: 1, 1, 1>}]} {
    %c0_i32 = arith.constant 0 : i32
    %0 = arith.cmpi eq, %arg1, %c0_i32 : i32
    %1 = arith.extui %0 : i1 to i32
    %c0_i32_0 = arith.constant 0 : i32
    %2 = arith.cmpi ne, %1, %c0_i32_0 : i32
    scf.if %2 {
      %cst = arith.constant 0.000000e+00 : f32
      %13 = vector.broadcast %cst : f32 to vector<16x128xf32>
      %c0_10 = arith.constant 0 : index
      %c0_11 = arith.constant 0 : index
      %14 = vector.load %arg5[%c0_10, %c0_11] : memref<16x128xf32, #tpu.memory_space<vmem>>, vector<16x128xf32>
      tpu.vector_store %arg5[%c0_10, %c0_11], %13 {strides = array<i32>} : memref<16x128xf32, #tpu.memory_space<vmem>>, vector<16x128xf32>,
    } else {
    }
    %c0 = arith.constant 0 : index
    %c0_1 = arith.constant 0 : index
    %3 = vector.load %arg2[%c0, %c0_1] : memref<16x128xf32, #tpu.memory_space<vmem>>, vector<16x128xf32>
    %c0_2 = arith.constant 0 : index
    %c0_3 = arith.constant 0 : index
    %4 = vector.load %arg3[%c0_2, %c0_3] : memref<16x128xf32, #tpu.memory_space<vmem>>, vector<16x128xf32>
    %5 = arith.subf %3, %4 : vector<16x128xf32>
    %6 = arith.mulf %5, %5 : vector<16x128xf32>
    %c0_4 = arith.constant 0 : index
    %c0_5 = arith.constant 0 : index
    %7 = vector.load %arg5[%c0_4, %c0_5] : memref<16x128xf32, #tpu.memory_space<vmem>>, vector<16x128xf32>
    %8 = arith.addf %7, %6 : vector<16x128xf32>
    %c0_6 = arith.constant 0 : index
    %c0_7 = arith.constant 0 : index
    %9 = vector.load %arg5[%c0_6, %c0_7] : memref<16x128xf32, #tpu.memory_space<vmem>>, vector<16x128xf32>
    tpu.vector_store %arg5[%c0_6, %c0_7], %8 {strides = array<i32>} : memref<16x128xf32, #tpu.memory_space<vmem>>, vector<16x128xf32>,
    %c0_i32_8 = arith.constant 0 : i32
    %10 = arith.cmpi eq, %arg1, %c0_i32_8 : i32
    %11 = arith.extui %10 : i1 to i32
    %c0_i32_9 = arith.constant 0 : i32
    %12 = arith.cmpi ne, %11, %c0_i32_9 : i32
    scf.if %12 {
      %c0_10 = arith.constant 0 : index
      %c0_11 = arith.constant 0 : index
      %13 = vector.load %arg5[%c0_10, %c0_11] : memref<16x128xf32, #tpu.memory_space<vmem>>, vector<16x128xf32>
      %14 = vector.shape_cast %13 : vector<16x128xf32> to vector<1x16x128xf32>
      %cst = arith.constant dense<0.000000e+00> : vector<1xf32>
      %15 = vector.multi_reduction <add>, %14, %cst [1, 2] : vector<1x16x128xf32> to vector<1xf32>
      %16 = vector.shape_cast %15 : vector<1xf32> to vector<1x1x1xf32>
      %17 = vector.extract %16[0, 0, 0] : f32 from vector<1x1x1xf32>
      %18 = vector.broadcast %17 : f32 to vector<1x1xf32>
      %c0_12 = arith.constant 0 : index
      %c0_13 = arith.constant 0 : index
      %c0_14 = arith.constant 0 : index
      %19 = vector.load %arg4[%c0_12, %c0_13, %c0_14] : memref<1x1x1xf32, #tpu.memory_space<vmem>>, vector<1x1x1xf32>
      %20 = vector.shape_cast %19 : vector<1x1x1xf32> to vector<1x1xf32>
      %21 = vector.shape_cast %18 : vector<1x1xf32> to vector<1x1x1xf32>
      tpu.vector_store %arg4[%c0_12, %c0_13, %c0_14], %21 {strides = array<i32>} : memref<1x1x1xf32, #tpu.memory_space<vmem>>, vector<1x1x1xf32>,
    } else {
    }
    return
  }
  func.func @transform_0(%arg0: i32, %arg1: i32) -> (i32, i32) {
    %c1_i32 = arith.constant 1 : i32
    %0 = arith.muli %arg0, %c1_i32 : i32
    %1 = arith.addi %0, %arg1 : i32
    %c0_i32 = arith.constant 0 : i32
    %2 = arith.minsi %1, %c0_i32 : i32
    %c0_i32_0 = arith.constant 0 : i32
    %c0_i32_1 = arith.constant 0 : i32
    return %2, %c0_i32_0 : i32, i32
  }
  func.func @transform_1(%arg0: i32, %arg1: i32) -> (i32, i32) {
    %c1_i32 = arith.constant 1 : i32
    %0 = arith.muli %arg0, %c1_i32 : i32
    %1 = arith.addi %0, %arg1 : i32
    %c0_i32 = arith.constant 0 : i32
    %2 = arith.minsi %1, %c0_i32 : i32
    %c0_i32_0 = arith.constant 0 : i32
    %c0_i32_1 = arith.constant 0 : i32
    return %2, %c0_i32_0 : i32, i32
  }
  func.func @transform_2(%arg0: i32, %arg1: i32) -> (i32, i32, i32) {
    %c0_i32 = arith.constant 0 : i32
    %c0_i32_0 = arith.constant 0 : i32
    %c0_i32_1 = arith.constant 0 : i32
    return %arg0, %c0_i32, %c0_i32_0 : i32, i32, i32
  }
}

</mosaic_0001>

<bundles_post_ra>
// kernel: tpu_custom_call.1
= control target key start
LH: loop header
LB: loop body
LE: loop exit
PB: predicated region body
PF: predicated region fallthrough
CT: control target
= control target key end

     0   :  { %7 = vsyncpa [#allocation4], 0  ;;  %s253_s0 = inlined_call_operand.hbm [shape: f32[16,128], index: 0, kind: input, shape index: {}]   ;;  %s254_s1 = inlined_call_operand.hbm [shape: f32[16,128], index: 1, kind: input, shape index: {}]   ;;  %s255_s2 = inlined_call_operand.hbm [shape: f32[1,1,1], index: 2, kind: output, shape index: {}]  }
   0x1   :  { %8 = vsyncpa [#allocation7], 0 }
   0x2   :  { %9 = vsyncpa [#allocation5], 0  ;;  %s197_s9 = smov [#allocation3]   ;;  %s125_s13 = scalar_lea.hbm %s253_s0, 256 }
   0x3   :  { %s21_s10 = sshll.u32 %s197_s9, 4  ;;  %p126_p0 = scmp.ne.s32.totalorder %s253_s0, %s125_s13  ;;  %s22_s10 = int_to_ptr.vmem [resolvable:$true] %s21_s10 }
   0x4   :  { %p129_p1 = scmp.lt.u32.totalorder %s125_s13, %s253_s0 }
   0x6   :  { %p131_p2 = pnand %p129_p1, %p126_p0 }
   0x8   :  { %134 = shalt.err (!%p131_p2)
}
   0x9   :  { %s135_s18 = scalar_lea.vmem %s22_s10, 256  ;;  %p140_p4 = scmp.lt.s32.totalorder %s22_s10, %s22_s10 }
   0xa   :  { %p136_p3 = scmp.ne.s32.totalorder %s22_s10, %s135_s18  ;;  %p141_p5 = scmp.lt.s32.totalorder %s135_s18, %s135_s18 }
   0xc   :  { %p142_p6 = por %p141_p5, %p140_p4 }
   0xe   :  { %p143_p7 = pnand %p142_p6, %p136_p3 }
  0x10   :  { %146 = shalt.err (!%p143_p7)
}
  0x11   :  { %s198_s19 = smov 128   ;;  %s199_s20 = smov 8  }
  0x12   :  { %27 = dma.hbm_to_vmem [thread:$0]  %s253_s0, 256, %s22_s10, [#allocation4], %s198_s19, %s198_s19, %s199_s20  }
  0x13   :  { %s200_s23 = smov [#allocation6]   ;;  %s147_s27 = scalar_lea.hbm %s254_s1, 256 }
  0x14   :  { %s39_s24 = sshll.u32 %s200_s23, 4  ;;  %p148_p8 = scmp.ne.s32.totalorder %s254_s1, %s147_s27  ;;  %s40_s24 = int_to_ptr.vmem [resolvable:$true] %s39_s24 }
  0x15   :  { %p151_p9 = scmp.lt.u32.totalorder %s147_s27, %s254_s1 }
  0x17   :  { %p153_p10 = pnand %p151_p9, %p148_p8 }
  0x19   :  { %156 = shalt.err (!%p153_p10)
}
  0x1a   :  { %s157_s4 = scalar_lea.vmem %s40_s24, 256  ;;  %p162_p12 = scmp.lt.s32.totalorder %s40_s24, %s40_s24 }
  0x1b   :  { %p158_p11 = scmp.ne.s32.totalorder %s40_s24, %s157_s4  ;;  %p163_p13 = scmp.lt.s32.totalorder %s157_s4, %s157_s4 }
  0x1d   :  { %p164_p0 = por %p163_p13, %p162_p12 }
  0x1f   :  { %p165_p1 = pnand %p164_p0, %p158_p11 }
  0x21   :  { %168 = shalt.err (!%p165_p1)
}
  0x22   :  { %45 = dma.hbm_to_vmem [thread:$0]  %s254_s1, 256, %s40_s24, [#allocation7], %s198_s19, %s198_s19, %s199_s20  }
  0x23   :  { %191 = dma.done.wait [#allocation4], 256  }
  0x24   :  { %192 = vsyncadd [#allocation4], 4294967040 }
  0x25   :  { %193 = dma.done.wait [#allocation7], 256  }
  0x26   :  { %194 = vsyncadd [#allocation7], 4294967040  ;;  %v66_v0 = vld [vmem:[#allocation3] sm:$0xff]  ;;  %v67_v1 = vld [vmem:[#allocation3 + $0x8] sm:$0xff]  ;;  %s201_s1 = smov [#allocation8]   ;;  %vm96_vm0 = vcmask 0  }
  0x27   :  { %v68_v2 = vld [vmem:[#allocation6] sm:$0xff]  ;;  %v69_v3 = vld [vmem:[#allocation6 + $0x8] sm:$0xff]  ;;  %s104_s6 = sshll.u32 %s201_s1, 4  ;;  %s105_s6 = int_to_ptr.vmem [resolvable:$true] %s104_s6 }
  0x28   :  { %v70_v4 = vsub.f32 %v66_v0, %v68_v2  ;;  %v71_v5 = vsub.f32 %v67_v1, %v69_v3  ;;  %s169_s8 = scalar_lea.vmem %s105_s6, 16  ;;  %s173_s9 = scalar_lea.vmem %s105_s6, 32 }
  0x29   :  { %p170_p2 = scmp.ne.s32.totalorder %s105_s6, %s169_s8  ;;  %p174_p3 = scmp.lt.s32.totalorder %s105_s6, %s105_s6 }
  0x2a   :  { %v72_v6 = vmul.f32 %v70_v4, %v70_v4  ;;  %v73_v7 = vmul.f32 %v71_v5, %v71_v5  ;;  %p175_p4 = scmp.lt.s32.totalorder %s173_s9, %s169_s8 }
  0x2c   :  { %v85_v8 = vadd.f32 %v73_v7, %v72_v6  ;;  %p176_p5 = por %p175_p4, %p174_p3 }
  0x2e   :  { %86 = vadd.xlane.f32.xlu0 %v85_v8  ;;  %p177_p6 = pnand %p176_p5, %p170_p2 }
  0xbb   :  { %v87_v9 = vpop.xlane.xlu0 %86 }
  0xbc   :  { %v88_v10 = vrot.slane %v87_v9, 4 }
  0xbe   :  { %v89_v11 = vadd.f32 %v88_v10, %v87_v9 }
  0xc0   :  { %v90_v12 = vrot.slane %v89_v11, 2 }
  0xc2   :  { %v91_v13 = vadd.f32 %v90_v12, %v89_v11 }
  0xc4   :  { %v92_v14 = vrot.slane %v91_v13, 1 }
  0xc6   :  { %v93_v15 = vadd.f32 %v92_v14, %v91_v13 }
  0xc8   :  { %118 = vpush %v93_v15 }
  0xf9   :  { %s119_s7 = spop %118 }
  0xfa   :  { %v95_v16 = vstv %s119_s7 }
  0xfb   :  { %97 = vst.msk [vmem:[#allocation8] sm:$0x1] %vm96_vm0, %v95_v16 }
  0xfc   :  { %180 = shalt.err (!%p177_p6)
}
  0xfd   :  { %s181_s12 = scalar_lea.hbm %s255_s2, 16 }
  0xfe   :  { %p182_p7 = scmp.ne.s32.totalorder %s255_s2, %s181_s12  ;;  %p185_p8 = scmp.lt.u32.totalorder %s181_s12, %s255_s2 }
 0x100   :  { %p187_p9 = pnand %p185_p8, %p182_p7 }
 0x102   :  { %190 = shalt.err (!%p187_p9)
}
 0x103   :  { %107 = dma.vmem_to_hbm [thread:$0]  %s105_s6, 16, %s255_s2, [#allocation5]  }
 0x104   :  { %195 = dma.done.wait [#allocation5], 16  }
 0x105   :  { %196 = vsyncadd [#allocation5], 4294967280 }
 0x106   :  { %111 = vsyncpa [#allocation4], 1 }
 0x107   :  { %112 = vsyncpa [#allocation7], 1 }
 0x108   :  { %113 = vsyncpa [#allocation5], 1 }

</bundles_post_ra>
